<compile_context>
chip_gen: v5e
topology: v5e:2x2
jax: 0.10.0
libtpu: 0.0.40
codegen_flags: <defaults>
</compile_context>

<pallas_src>
import jax
import jax.numpy as jnp
from jax.experimental import pallas as pl
from jax.experimental.pallas import tpu as pltpu

LANE = 128


# ----------------------------- helpers -------------------------------------

def _round_up(x, m):
    return ((x + m - 1) // m) * m


def _pad2(x, rows, cols):
    return jnp.pad(x, ((0, rows - x.shape[0]), (0, cols - x.shape[1])))


def _choose_tiles(n_pad):
    # n_pad is a multiple of 128.  Moderate tiles keep the double-buffered
    # A_hat stream small enough for v7x's 64 MiB VMEM while staying big enough
    # to amortize per-step pipeline overhead on v5e/v6e.
    tm = 256 if n_pad % 256 == 0 else 128
    if n_pad % 512 == 0:
        tk = 512
    elif n_pad % 256 == 0:
        tk = 256
    else:
        tk = 128
    return tm, tk


# ----------------------------- Pallas kernels ------------------------------

def _sgc_layer0_kernel(a_ref, xk_ref, w_ref, b_ref, xi_ref, rw_ref, rb_ref,
                       o_ref, acc_ref):
    """First layer: fused SGConv + Linear residual projection."""
    k = pl.program_id(1)

    @pl.when(k == 0)
    def _():
        acc_ref[...] = jnp.zeros_like(acc_ref)

    # acc += A_hat[i, k] @ X[k, :]   (bf16 MXU, f32 accumulation)
    acc_ref[...] += jnp.dot(
        a_ref[...], xk_ref[...].astype(jnp.bfloat16),
        preferred_element_type=jnp.float32)

    @pl.when(k == pl.num_programs(1) - 1)
    def _():
        z = jnp.dot(acc_ref[...], w_ref[...],
                    preferred_element_type=jnp.float32) + b_ref[...]
        res = jnp.dot(xi_ref[...], rw_ref[...],
                      preferred_element_type=jnp.float32) + rb_ref[...]
        o_ref[...] = jnp.maximum(z, 0.0) + res


def _sgc_layer_kernel(a_ref, xk_ref, w_ref, b_ref, xi_ref, o_ref, acc_ref):
    """Layers > 0: SGConv with identity residual."""
    k = pl.program_id(1)

    @pl.when(k == 0)
    def _():
        acc_ref[...] = jnp.zeros_like(acc_ref)

    acc_ref[...] += jnp.dot(
        a_ref[...], xk_ref[...].astype(jnp.bfloat16),
        preferred_element_type=jnp.float32)

    @pl.when(k == pl.num_programs(1) - 1)
    def _():
        z = jnp.dot(acc_ref[...], w_ref[...],
                    preferred_element_type=jnp.float32) + b_ref[...]
        o_ref[...] = jnp.maximum(z, 0.0) + xi_ref[...]


# ----------------------------- wrappers ------------------------------------

_COMPILER_PARAMS = pltpu.CompilerParams(
    dimension_semantics=("parallel", "arbitrary"),   # rows shard across TCs (v7x)
    vmem_limit_bytes=48 * 1024 * 1024,               # headroom on v7x's 64 MiB
)


def sgc_layer0_pallas(a_bf16, x, w, b, rw, rb, *, tm, tk):
    n_pad = a_bf16.shape[0]
    c_pad = x.shape[1]
    h_pad = w.shape[1]
    grid = (n_pad // tm, n_pad // tk)
    return pl.pallas_call(
        _sgc_layer0_kernel,
        out_shape=jax.ShapeDtypeStruct((n_pad, h_pad), jnp.float32),
        grid_spec=pltpu.PrefetchScalarGridSpec(
            num_scalar_prefetch=0,
            grid=grid,
            in_specs=[
                pl.BlockSpec((tm, tk), lambda i, k: (i, k)),        # A_hat tile
                pl.BlockSpec((tk, c_pad), lambda i, k: (k, 0)),     # X (propagated)
                pl.BlockSpec((c_pad, h_pad), lambda i, k: (0, 0)),  # W
                pl.BlockSpec((1, h_pad), lambda i, k: (0, 0)),      # b
                pl.BlockSpec((tm, c_pad), lambda i, k: (i, 0)),     # X (residual rows)
                pl.BlockSpec((c_pad, h_pad), lambda i, k: (0, 0)),  # res_w
                pl.BlockSpec((1, h_pad), lambda i, k: (0, 0)),      # res_b
            ],
            out_specs=pl.BlockSpec((tm, h_pad), lambda i, k: (i, 0)),
            scratch_shapes=[pltpu.VMEM((tm, c_pad), jnp.float32)],
        ),
        compiler_params=_COMPILER_PARAMS,
    )(a_bf16, x, w, b, x, rw, rb)


def sgc_layer_pallas(a_bf16, x, w, b, *, tm, tk):
    n_pad = a_bf16.shape[0]
    c_pad = x.shape[1]
    h_pad = w.shape[1]
    grid = (n_pad // tm, n_pad // tk)
    return pl.pallas_call(
        _sgc_layer_kernel,
        out_shape=jax.ShapeDtypeStruct((n_pad, h_pad), jnp.float32),
        grid_spec=pltpu.PrefetchScalarGridSpec(
            num_scalar_prefetch=0,
            grid=grid,
            in_specs=[
                pl.BlockSpec((tm, tk), lambda i, k: (i, k)),        # A_hat tile
                pl.BlockSpec((tk, c_pad), lambda i, k: (k, 0)),     # X (propagated)
                pl.BlockSpec((c_pad, h_pad), lambda i, k: (0, 0)),  # W
                pl.BlockSpec((1, h_pad), lambda i, k: (0, 0)),      # b
                pl.BlockSpec((tm, c_pad), lambda i, k: (i, 0)),     # X (identity residual)
            ],
            out_specs=pl.BlockSpec((tm, h_pad), lambda i, k: (i, 0)),
            scratch_shapes=[pltpu.VMEM((tm, c_pad), jnp.float32)],
        ),
        compiler_params=_COMPILER_PARAMS,
    )(a_bf16, x, w, b, x)


# ----------------------------- model ---------------------------------------

def build_normalized_adj(src, dst, n):
    # A[v, u] = #edges u -> v (message passing sums over in-edges)
    a = jnp.zeros((n, n), jnp.float32).at[dst, src].add(1.0)
    deg_in = jnp.maximum(a.sum(axis=1), 1.0)          # clamp(min=1), DGL SGConv
    norm = deg_in ** -0.5
    return norm[:, None] * a * norm[None, :]


def init_params(key, in_c, hid_c, n_layers):
    params = {"conv": []}
    keys = jax.random.split(key, 2 * n_layers + 2)
    for i in range(n_layers):
        ci = in_c if i == 0 else hid_c
        scale = 1.0 / jnp.sqrt(jnp.float32(ci))
        w = jax.random.uniform(keys[2 * i], (ci, hid_c), jnp.float32, -scale, scale)
        b = jax.random.uniform(keys[2 * i + 1], (1, hid_c), jnp.float32, -scale, scale)
        params["conv"].append((w, b))
    rscale = 1.0 / jnp.sqrt(jnp.float32(in_c))
    params["res_w"] = jax.random.uniform(keys[-2], (in_c, hid_c), jnp.float32, -rscale, rscale)
    params["res_b"] = jax.random.uniform(keys[-1], (1, hid_c), jnp.float32, -rscale, rscale)
    return params


def sg_model_forward(a_hat, features, params):
    n, in_c = features.shape
    hid_c = params["conv"][0][0].shape[1]

    n_pad = _round_up(n, LANE)
    c0_pad = _round_up(in_c, LANE)       # lane-dense input channels
    h_pad = _round_up(hid_c, LANE)       # lane-dense hidden dim
    tm, tk = _choose_tiles(n_pad)

    # Zero-pad; zero columns/rows keep the padded lanes inert through
    # matmul + bias + relu + residual.  A_hat -> bf16 (dominant HBM stream).
    a_pad = _pad2(a_hat, n_pad, n_pad).astype(jnp.bfloat16)
    feat = _pad2(features, n_pad, c0_pad)

    for i, (w, b) in enumerate(params["conv"]):
        b_p = _pad2(b, 1, h_pad)
        if i == 0:
            w_p = _pad2(w, c0_pad, h_pad)
            rw_p = _pad2(params["res_w"], c0_pad, h_pad)
            rb_p = _pad2(params["res_b"], 1, h_pad)
            feat = sgc_layer0_pallas(a_pad, feat, w_p, b_p, rw_p, rb_p, tm=tm, tk=tk)
        else:
            w_p = _pad2(w, h_pad, h_pad)
            feat = sgc_layer_pallas(a_pad, feat, w_p, b_p, tm=tm, tk=tk)

    return feat[:n, :hid_c]


def sg_model_forward_ref(a_hat, features, params):
    # pure-jnp f32 reference (original module semantics)
    feat = features
    for i, (w, b) in enumerate(params["conv"]):
        if i == 0:
            res = features @ params["res_w"] + params["res_b"]
        else:
            res = feat
        feat = jnp.maximum(a_hat @ feat @ w + b, 0.0) + res
    return feat


# ----------------------------- main ----------------------------------------

if __name__ == "__main__":
    N_NODES, IN_C, HID_C, N_LAYERS = 8, 4, 32, 2

    # small ring graph + chords; every node has in-degree >= 1 (DGL requirement)
    src = jnp.array([0, 1, 2, 3, 4, 5, 6, 7, 0, 2, 4, 6], dtype=jnp.int32)
    dst = jnp.array([1, 2, 3, 4, 5, 6, 7, 0, 4, 6, 0, 2], dtype=jnp.int32)
    a_hat = build_normalized_adj(src, dst, N_NODES)

    key = jax.random.PRNGKey(0)
    k_param, k_feat = jax.random.split(key)
    params = init_params(k_param, IN_C, HID_C, N_LAYERS)
    features = jax.random.normal(k_feat, (N_NODES, IN_C), jnp.float32)

    fwd = jax.jit(sg_model_forward)
    out = jax.block_until_ready(fwd(a_hat, features, params))

    ref = sg_model_forward_ref(a_hat, features, params)
    assert out.shape == (N_NODES, HID_C)
    # bf16 A_hat / bf16 MXU propagation (f32 accumulate) -> small drift vs f32 ref
    assert jnp.allclose(out, ref, atol=5e-2, rtol=5e-2), float(jnp.max(jnp.abs(out - ref)))

    print("KERNEL_OK")
</pallas_src>

<mosaic_0001>
module attributes {stable_mosaic.version = 11 : i64} {
  func.func @_sgc_layer0_kernel(%arg0: i32, %arg1: i32, %arg2: memref<128x128xbf16, #tpu.memory_space<vmem>>, %arg3: memref<128x128xf32, #tpu.memory_space<vmem>>, %arg4: memref<128x128xf32, #tpu.memory_space<vmem>>, %arg5: memref<1x128xf32, #tpu.memory_space<vmem>>, %arg6: memref<128x128xf32, #tpu.memory_space<vmem>>, %arg7: memref<128x128xf32, #tpu.memory_space<vmem>>, %arg8: memref<1x128xf32, #tpu.memory_space<vmem>>, %arg9: memref<128x128xf32, #tpu.memory_space<vmem>>, %arg10: memref<128x128xf32, #tpu.memory_space<vmem>>) attributes {dimension_semantics = [#tpu.dimension_semantics<parallel>, #tpu.dimension_semantics<arbitrary>], iteration_bounds = array<i64: 1, 1>, scalar_prefetch = 0 : i64, scratch_operands = 1 : i64, tpu.core_type = #tpu.core_type<tc>, window_params = [{transform_indices = @transform_0, window_bounds = array<i64: 128, 128>}, {transform_indices = @transform_1, window_bounds = array<i64: 128, 128>}, {pipeline_mode = #tpu.pipeline_mode<synchronous>, transform_indices = @transform_2, window_bounds = array<i64: 128, 128>}, {pipeline_mode = #tpu.pipeline_mode<synchronous>, transform_indices = @transform_3, window_bounds = array<i64: 1, 128>}, {transform_indices = @transform_4, window_bounds = array<i64: 128, 128>}, {pipeline_mode = #tpu.pipeline_mode<synchronous>, transform_indices = @transform_5, window_bounds = array<i64: 128, 128>}, {pipeline_mode = #tpu.pipeline_mode<synchronous>, transform_indices = @transform_6, window_bounds = array<i64: 1, 128>}, {transform_indices = @transform_7, window_bounds = array<i64: 128, 128>}]} {
    %c0_i32 = arith.constant 0 : i32
    %0 = arith.cmpi eq, %arg1, %c0_i32 : i32
    %1 = arith.extui %0 : i1 to i32
    %c0_i32_0 = arith.constant 0 : i32
    %2 = arith.cmpi ne, %1, %c0_i32_0 : i32
    scf.if %2 {
      %cst_10 = arith.constant 0.000000e+00 : f32
      %13 = vector.broadcast %cst_10 : f32 to vector<128x128xf32>
      %c0_11 = arith.constant 0 : index
      %c0_12 = arith.constant 0 : index
      %14 = vector.load %arg10[%c0_11, %c0_12] : memref<128x128xf32, #tpu.memory_space<vmem>>, vector<128x128xf32>
      tpu.vector_store %arg10[%c0_11, %c0_12], %13 {strides = array<i32>} : memref<128x128xf32, #tpu.memory_space<vmem>>, vector<128x128xf32>,
    } else {
    }
    %c0 = arith.constant 0 : index
    %c0_1 = arith.constant 0 : index
    %3 = vector.load %arg10[%c0, %c0_1] : memref<128x128xf32, #tpu.memory_space<vmem>>, vector<128x128xf32>
    %c0_2 = arith.constant 0 : index
    %c0_3 = arith.constant 0 : index
    %4 = vector.load %arg2[%c0_2, %c0_3] : memref<128x128xbf16, #tpu.memory_space<vmem>>, vector<128x128xbf16>
    %c0_4 = arith.constant 0 : index
    %c0_5 = arith.constant 0 : index
    %5 = vector.load %arg3[%c0_4, %c0_5] : memref<128x128xf32, #tpu.memory_space<vmem>>, vector<128x128xf32>
    %6 = arith.truncf %5 : vector<128x128xf32> to vector<128x128xbf16>
    %cst = arith.constant dense<0.000000e+00> : vector<128x128xf32>
    %7 = tpu.matmul %4, %6, %cst {dimension_numbers = #tpu.dot_dimension_numbers<[1], [0], [0], [1], [0, 0, 1, 1], [], []>} : vector<128x128xbf16>, vector<128x128xbf16>, vector<128x128xf32> -> vector<128x128xf32>
    %8 = arith.addf %3, %7 : vector<128x128xf32>
    %c0_6 = arith.constant 0 : index
    %c0_7 = arith.constant 0 : index
    %9 = vector.load %arg10[%c0_6, %c0_7] : memref<128x128xf32, #tpu.memory_space<vmem>>, vector<128x128xf32>
    tpu.vector_store %arg10[%c0_6, %c0_7], %8 {strides = array<i32>} : memref<128x128xf32, #tpu.memory_space<vmem>>, vector<128x128xf32>,
    %c0_i32_8 = arith.constant 0 : i32
    %10 = arith.cmpi eq, %arg1, %c0_i32_8 : i32
    %11 = arith.extui %10 : i1 to i32
    %c0_i32_9 = arith.constant 0 : i32
    %12 = arith.cmpi ne, %11, %c0_i32_9 : i32
    scf.if %12 {
      %c0_10 = arith.constant 0 : index
      %c0_11 = arith.constant 0 : index
      %13 = vector.load %arg10[%c0_10, %c0_11] : memref<128x128xf32, #tpu.memory_space<vmem>>, vector<128x128xf32>
      %c0_12 = arith.constant 0 : index
      %c0_13 = arith.constant 0 : index
      %14 = vector.load %arg4[%c0_12, %c0_13] : memref<128x128xf32, #tpu.memory_space<vmem>>, vector<128x128xf32>
      %cst_14 = arith.constant dense<0.000000e+00> : vector<128x128xf32>
      %15 = tpu.matmul %13, %14, %cst_14 {dimension_numbers = #tpu.dot_dimension_numbers<[1], [0], [0], [1], [0, 0, 1, 1], [], []>} : vector<128x128xf32>, vector<128x128xf32>, vector<128x128xf32> -> vector<128x128xf32>
      %c0_15 = arith.constant 0 : index
      %c0_16 = arith.constant 0 : index
      %16 = vector.load %arg5[%c0_15, %c0_16] : memref<1x128xf32, #tpu.memory_space<vmem>>, vector<1x128xf32>
      %17 = vector.broadcast %16 : vector<1x128xf32> to vector<128x128xf32>
      %18 = arith.addf %15, %17 : vector<128x128xf32>
      %c0_17 = arith.constant 0 : index
      %c0_18 = arith.constant 0 : index
      %19 = vector.load %arg6[%c0_17, %c0_18] : memref<128x128xf32, #tpu.memory_space<vmem>>, vector<128x128xf32>
      %c0_19 = arith.constant 0 : index
      %c0_20 = arith.constant 0 : index
      %20 = vector.load %arg7[%c0_19, %c0_20] : memref<128x128xf32, #tpu.memory_space<vmem>>, vector<128x128xf32>
      %cst_21 = arith.constant dense<0.000000e+00> : vector<128x128xf32>
      %21 = tpu.matmul %19, %20, %cst_21 {dimension_numbers = #tpu.dot_dimension_numbers<[1], [0], [0], [1], [0, 0, 1, 1], [], []>} : vector<128x128xf32>, vector<128x128xf32>, vector<128x128xf32> -> vector<128x128xf32>
      %c0_22 = arith.constant 0 : index
      %c0_23 = arith.constant 0 : index
      %22 = vector.load %arg8[%c0_22, %c0_23] : memref<1x128xf32, #tpu.memory_space<vmem>>, vector<1x128xf32>
      %23 = vector.broadcast %22 : vector<1x128xf32> to vector<128x128xf32>
      %24 = arith.addf %21, %23 : vector<128x128xf32>
      %cst_24 = arith.constant 0.000000e+00 : f32
      %25 = vector.broadcast %cst_24 : f32 to vector<128x128xf32>
      %26 = arith.maximumf %18, %25 : vector<128x128xf32>
      %27 = arith.addf %26, %24 : vector<128x128xf32>
      %c0_25 = arith.constant 0 : index
      %c0_26 = arith.constant 0 : index
      %28 = vector.load %arg9[%c0_25, %c0_26] : memref<128x128xf32, #tpu.memory_space<vmem>>, vector<128x128xf32>
      tpu.vector_store %arg9[%c0_25, %c0_26], %27 {strides = array<i32>} : memref<128x128xf32, #tpu.memory_space<vmem>>, vector<128x128xf32>,
    } else {
    }
    return
  }
  func.func @transform_0(%arg0: i32, %arg1: i32) -> (i32, i32) {
    %c0_i32 = arith.constant 0 : i32
    return %arg0, %arg1 : i32, i32
  }
  func.func @transform_1(%arg0: i32, %arg1: i32) -> (i32, i32) {
    %c0_i32 = arith.constant 0 : i32
    %c0_i32_0 = arith.constant 0 : i32
    return %arg1, %c0_i32 : i32, i32
  }
  func.func @transform_2(%arg0: i32, %arg1: i32) -> (i32, i32) {
    %c0_i32 = arith.constant 0 : i32
    %c0_i32_0 = arith.constant 0 : i32
    %c0_i32_1 = arith.constant 0 : i32
    return %c0_i32, %c0_i32_0 : i32, i32
  }
  func.func @transform_3(%arg0: i32, %arg1: i32) -> (i32, i32) {
    %c0_i32 = arith.constant 0 : i32
    %c0_i32_0 = arith.constant 0 : i32
    %c0_i32_1 = arith.constant 0 : i32
    return %c0_i32, %c0_i32_0 : i32, i32
  }
  func.func @transform_4(%arg0: i32, %arg1: i32) -> (i32, i32) {
    %c0_i32 = arith.constant 0 : i32
    %c0_i32_0 = arith.constant 0 : i32
    return %arg0, %c0_i32 : i32, i32
  }
  func.func @transform_5(%arg0: i32, %arg1: i32) -> (i32, i32) {
    %c0_i32 = arith.constant 0 : i32
    %c0_i32_0 = arith.constant 0 : i32
    %c0_i32_1 = arith.constant 0 : i32
    return %c0_i32, %c0_i32_0 : i32, i32
  }
  func.func @transform_6(%arg0: i32, %arg1: i32) -> (i32, i32) {
    %c0_i32 = arith.constant 0 : i32
    %c0_i32_0 = arith.constant 0 : i32
    %c0_i32_1 = arith.constant 0 : i32
    return %c0_i32, %c0_i32_0 : i32, i32
  }
  func.func @transform_7(%arg0: i32, %arg1: i32) -> (i32, i32) {
    %c0_i32 = arith.constant 0 : i32
    %c0_i32_0 = arith.constant 0 : i32
    return %arg0, %c0_i32 : i32, i32
  }
}

module attributes {stable_mosaic.version = 11 : i64} {
  func.func @_sgc_layer_kernel(%arg0: i32, %arg1: i32, %arg2: memref<128x128xbf16, #tpu.memory_space<vmem>>, %arg3: memref<128x128xf32, #tpu.memory_space<vmem>>, %arg4: memref<128x128xf32, #tpu.memory_space<vmem>>, %arg5: memref<1x128xf32, #tpu.memory_space<vmem>>, %arg6: memref<128x128xf32, #tpu.memory_space<vmem>>, %arg7: memref<128x128xf32, #tpu.memory_space<vmem>>, %arg8: memref<128x128xf32, #tpu.memory_space<vmem>>) attributes {dimension_semantics = [#tpu.dimension_semantics<parallel>, #tpu.dimension_semantics<arbitrary>], iteration_bounds = array<i64: 1, 1>, scalar_prefetch = 0 : i64, scratch_operands = 1 : i64, tpu.core_type = #tpu.core_type<tc>, window_params = [{transform_indices = @transform_0, window_bounds = array<i64: 128, 128>}, {transform_indices = @transform_1, window_bounds = array<i64: 128, 128>}, {pipeline_mode = #tpu.pipeline_mode<synchronous>, transform_indices = @transform_2, window_bounds = array<i64: 128, 128>}, {pipeline_mode = #tpu.pipeline_mode<synchronous>, transform_indices = @transform_3, window_bounds = array<i64: 1, 128>}, {transform_indices = @transform_4, window_bounds = array<i64: 128, 128>}, {transform_indices = @transform_5, window_bounds = array<i64: 128, 128>}]} {
    %c0_i32 = arith.constant 0 : i32
    %0 = arith.cmpi eq, %arg1, %c0_i32 : i32
    %1 = arith.extui %0 : i1 to i32
    %c0_i32_0 = arith.constant 0 : i32
    %2 = arith.cmpi ne, %1, %c0_i32_0 : i32
    scf.if %2 {
      %cst_10 = arith.constant 0.000000e+00 : f32
      %13 = vector.broadcast %cst_10 : f32 to vector<128x128xf32>
      %c0_11 = arith.constant 0 : index
      %c0_12 = arith.constant 0 : index
      %14 = vector.load %arg8[%c0_11, %c0_12] : memref<128x128xf32, #tpu.memory_space<vmem>>, vector<128x128xf32>
      tpu.vector_store %arg8[%c0_11, %c0_12], %13 {strides = array<i32>} : memref<128x128xf32, #tpu.memory_space<vmem>>, vector<128x128xf32>,
    } else {
    }
    %c0 = arith.constant 0 : index
    %c0_1 = arith.constant 0 : index
    %3 = vector.load %arg8[%c0, %c0_1] : memref<128x128xf32, #tpu.memory_space<vmem>>, vector<128x128xf32>
    %c0_2 = arith.constant 0 : index
    %c0_3 = arith.constant 0 : index
    %4 = vector.load %arg2[%c0_2, %c0_3] : memref<128x128xbf16, #tpu.memory_space<vmem>>, vector<128x128xbf16>
    %c0_4 = arith.constant 0 : index
    %c0_5 = arith.constant 0 : index
    %5 = vector.load %arg3[%c0_4, %c0_5] : memref<128x128xf32, #tpu.memory_space<vmem>>, vector<128x128xf32>
    %6 = arith.truncf %5 : vector<128x128xf32> to vector<128x128xbf16>
    %cst = arith.constant dense<0.000000e+00> : vector<128x128xf32>
    %7 = tpu.matmul %4, %6, %cst {dimension_numbers = #tpu.dot_dimension_numbers<[1], [0], [0], [1], [0, 0, 1, 1], [], []>} : vector<128x128xbf16>, vector<128x128xbf16>, vector<128x128xf32> -> vector<128x128xf32>
    %8 = arith.addf %3, %7 : vector<128x128xf32>
    %c0_6 = arith.constant 0 : index
    %c0_7 = arith.constant 0 : index
    %9 = vector.load %arg8[%c0_6, %c0_7] : memref<128x128xf32, #tpu.memory_space<vmem>>, vector<128x128xf32>
    tpu.vector_store %arg8[%c0_6, %c0_7], %8 {strides = array<i32>} : memref<128x128xf32, #tpu.memory_space<vmem>>, vector<128x128xf32>,
    %c0_i32_8 = arith.constant 0 : i32
    %10 = arith.cmpi eq, %arg1, %c0_i32_8 : i32
    %11 = arith.extui %10 : i1 to i32
    %c0_i32_9 = arith.constant 0 : i32
    %12 = arith.cmpi ne, %11, %c0_i32_9 : i32
    scf.if %12 {
      %c0_10 = arith.constant 0 : index
      %c0_11 = arith.constant 0 : index
      %13 = vector.load %arg8[%c0_10, %c0_11] : memref<128x128xf32, #tpu.memory_space<vmem>>, vector<128x128xf32>
      %c0_12 = arith.constant 0 : index
      %c0_13 = arith.constant 0 : index
      %14 = vector.load %arg4[%c0_12, %c0_13] : memref<128x128xf32, #tpu.memory_space<vmem>>, vector<128x128xf32>
      %cst_14 = arith.constant dense<0.000000e+00> : vector<128x128xf32>
      %15 = tpu.matmul %13, %14, %cst_14 {dimension_numbers = #tpu.dot_dimension_numbers<[1], [0], [0], [1], [0, 0, 1, 1], [], []>} : vector<128x128xf32>, vector<128x128xf32>, vector<128x128xf32> -> vector<128x128xf32>
      %c0_15 = arith.constant 0 : index
      %c0_16 = arith.constant 0 : index
      %16 = vector.load %arg5[%c0_15, %c0_16] : memref<1x128xf32, #tpu.memory_space<vmem>>, vector<1x128xf32>
      %17 = vector.broadcast %16 : vector<1x128xf32> to vector<128x128xf32>
      %18 = arith.addf %15, %17 : vector<128x128xf32>
      %cst_17 = arith.constant 0.000000e+00 : f32
      %19 = vector.broadcast %cst_17 : f32 to vector<128x128xf32>
      %20 = arith.maximumf %18, %19 : vector<128x128xf32>
      %c0_18 = arith.constant 0 : index
      %c0_19 = arith.constant 0 : index
      %21 = vector.load %arg6[%c0_18, %c0_19] : memref<128x128xf32, #tpu.memory_space<vmem>>, vector<128x128xf32>
      %22 = arith.addf %20, %21 : vector<128x128xf32>
      %c0_20 = arith.constant 0 : index
      %c0_21 = arith.constant 0 : index
      %23 = vector.load %arg7[%c0_20, %c0_21] : memref<128x128xf32, #tpu.memory_space<vmem>>, vector<128x128xf32>
      tpu.vector_store %arg7[%c0_20, %c0_21], %22 {strides = array<i32>} : memref<128x128xf32, #tpu.memory_space<vmem>>, vector<128x128xf32>,
    } else {
    }
    return
  }
  func.func @transform_0(%arg0: i32, %arg1: i32) -> (i32, i32) {
    %c0_i32 = arith.constant 0 : i32
    return %arg0, %arg1 : i32, i32
  }
  func.func @transform_1(%arg0: i32, %arg1: i32) -> (i32, i32) {
    %c0_i32 = arith.constant 0 : i32
    %c0_i32_0 = arith.constant 0 : i32
    return %arg1, %c0_i32 : i32, i32
  }
  func.func @transform_2(%arg0: i32, %arg1: i32) -> (i32, i32) {
    %c0_i32 = arith.constant 0 : i32
    %c0_i32_0 = arith.constant 0 : i32
    %c0_i32_1 = arith.constant 0 : i32
    return %c0_i32, %c0_i32_0 : i32, i32
  }
  func.func @transform_3(%arg0: i32, %arg1: i32) -> (i32, i32) {
    %c0_i32 = arith.constant 0 : i32
    %c0_i32_0 = arith.constant 0 : i32
    %c0_i32_1 = arith.constant 0 : i32
    return %c0_i32, %c0_i32_0 : i32, i32
  }
  func.func @transform_4(%arg0: i32, %arg1: i32) -> (i32, i32) {
    %c0_i32 = arith.constant 0 : i32
    %c0_i32_0 = arith.constant 0 : i32
    return %arg0, %c0_i32 : i32, i32
  }
  func.func @transform_5(%arg0: i32, %arg1: i32) -> (i32, i32) {
    %c0_i32 = arith.constant 0 : i32
    %c0_i32_0 = arith.constant 0 : i32
    return %arg0, %c0_i32 : i32, i32
  }
}

</mosaic_0001>

<bundles_post_ra>
// kernel: sg_model_forward.3
= control target key start
LH: loop header
LB: loop body
LE: loop exit
PB: predicated region body
PF: predicated region fallthrough
CT: control target
= control target key end

     0   :  { %s729_s1 = inlined_call_operand.vmem [shape: f32[128,128], index: 1, kind: input, shape index: {}, may-alias: {1,4}]   ;;  %s730_s0 = inlined_call_operand.vmem [shape: bf16[128,128], index: 0, kind: input, shape index: {}]   ;;  %s731_s2 = inlined_call_operand.vmem [shape: f32[128,128], index: 2, kind: input, shape index: {}]   ;;  %s732_s3 = inlined_call_operand.vmem [shape: f32[1,128], index: 3, kind: input, shape index: {}]   ;;  %s733_s4 = inlined_call_operand.vmem [shape: f32[128,128], index: 4, kind: input, shape index: {}, may-alias: {1,4}]   ;;  %s734_s5 = inlined_call_operand.vmem [shape: f32[128,128], index: 5, kind: output, shape index: {}]  }
   0x1   :  { %v86_v0 = vld [vmem:[%s729_s1 + $0x70] sm:$0xff]  ;;  %v87_v1 = vld [vmem:[%s729_s1 + $0x78] sm:$0xff]  ;;  %v84_v2 = vld [vmem:[%s729_s1 + $0x60] sm:$0xff] }
   0x2   :  { %v95_v3 = vpack.c.bf16 %v87_v1, %v86_v0  ;;  %v85_v4 = vld [vmem:[%s729_s1 + $0x68] sm:$0xff]  ;;  %v82_v6 = vld [vmem:[%s729_s1 + $0x50] sm:$0xff]  ;;  %v83_v7 = vld [vmem:[%s729_s1 + $0x58] sm:$0xff] }
   0x3   :  { %v94_v5 = vpack.c.bf16 %v85_v4, %v84_v2  ;;  %v93_v8 = vpack.c.bf16 %v83_v7, %v82_v6  ;;  %v80_v9 = vld [vmem:[%s729_s1 + $0x40] sm:$0xff]  ;;  %v81_v10 = vld [vmem:[%s729_s1 + $0x48] sm:$0xff]  ;;  %v78_v12 = vld [vmem:[%s729_s1 + $0x30] sm:$0xff] }
   0x4   :  { %437 = vmatpush.bf16.msra.mxu2 %v95_v3  ;;  %144 = vmatpush.bf16.msra.mxu0 %v95_v3  ;;  %v92_v11 = vpack.c.bf16 %v81_v10, %v80_v9  ;;  %v79_v13 = vld [vmem:[%s729_s1 + $0x38] sm:$0xff]  ;;  %v76_v15 = vld [vmem:[%s729_s1 + $0x20] sm:$0xff]  ;;  %v77_v16 = vld [vmem:[%s729_s1 + $0x28] sm:$0xff] }
   0x5   :  { %v91_v14 = vpack.c.bf16 %v79_v13, %v78_v12  ;;  %v90_v17 = vpack.c.bf16 %v77_v16, %v76_v15  ;;  %v74_v18 = vld [vmem:[%s729_s1 + $0x10] sm:$0xff]  ;;  %v75_v19 = vld [vmem:[%s729_s1 + $0x18] sm:$0xff]  ;;  %v72_v21 = vld [vmem:[%s729_s1] sm:$0xff] }
   0x6   :  { %v89_v20 = vpack.c.bf16 %v75_v19, %v74_v18  ;;  %v73_v22 = vld [vmem:[%s729_s1 + $0x8] sm:$0xff]  ;;  %v433_v24 = vld [vmem:[%s730_s0 + $0x20] sm:$0xff]  ;;  %v259_v28 = vld [vmem:[%s731_s2 + $0x78] sm:$0xff] }
   0x7   :  { %v88_v23 = vpack.c.bf16 %v73_v22, %v72_v21  ;;  %v429_v25 = vld [vmem:[%s730_s0] sm:$0xff]  ;;  %v434_v26 = vld [vmem:[%s730_s0 + $0x28] sm:$0xff]  ;;  %v258_v29 = vld [vmem:[%s731_s2 + $0x70] sm:$0xff]  ;;  %264 = vmatpush.msra.mxu1 %v259_v28  ;;  %445 = vmatpush.msra.mxu3 %v259_v28 }
   0x8   :  { %438 = vmatpush.bf16.msra.mxu2 %v94_v5  ;;  %145 = vmatpush.bf16.msra.mxu0 %v94_v5  ;;  %v430_v27 = vld [vmem:[%s730_s0 + $0x8] sm:$0xff]  ;;  %v256_v31 = vld [vmem:[%s731_s2 + $0x60] sm:$0xff]  ;;  %v255_v32 = vld [vmem:[%s731_s2 + $0x58] sm:$0xff] }
   0x9   :  { %v257_v30 = vld [vmem:[%s731_s2 + $0x68] sm:$0xff]  ;;  %265 = vmatpush.msra.mxu1 %v258_v29  ;;  %446 = vmatpush.msra.mxu3 %v258_v29  ;;  %v254_v33 = vld [vmem:[%s731_s2 + $0x50] sm:$0xff]  ;;  %v252_v37 = vld [vmem:[%s731_s2 + $0x40] sm:$0xff] }
   0xa   :  { %v253_v34 = vld [vmem:[%s731_s2 + $0x48] sm:$0xff]  ;;  %v435_v35 = vld [vmem:[%s730_s0 + $0x30] sm:$0xff]  ;;  %v251_v38 = vld [vmem:[%s731_s2 + $0x38] sm:$0xff] }
   0xb   :  { %266 = vmatpush.msra.mxu1 %v257_v30  ;;  %447 = vmatpush.msra.mxu3 %v257_v30  ;;  %v431_v36 = vld [vmem:[%s730_s0 + $0x10] sm:$0xff]  ;;  %v249_v40 = vld [vmem:[%s731_s2 + $0x28] sm:$0xff]  ;;  %v248_v41 = vld [vmem:[%s731_s2 + $0x20] sm:$0xff] }
   0xc   :  { %439 = vmatpush.bf16.msra.mxu2 %v93_v8  ;;  %146 = vmatpush.bf16.msra.mxu0 %v93_v8  ;;  %v250_v39 = vld [vmem:[%s731_s2 + $0x30] sm:$0xff]  ;;  %v247_v42 = vld [vmem:[%s731_s2 + $0x18] sm:$0xff]  ;;  %v245_v44 = vld [vmem:[%s731_s2 + $0x8] sm:$0xff] }
   0xd   :  { %267 = vmatpush.msra.mxu1 %v256_v31  ;;  %448 = vmatpush.msra.mxu3 %v256_v31  ;;  %v246_v43 = vld [vmem:[%s731_s2 + $0x10] sm:$0xff]  ;;  %v436_v45 = vld [vmem:[%s730_s0 + $0x38] sm:$0xff]  ;;  %v244_v47 = vld [vmem:[%s731_s2] sm:$0xff] }
   0xe   :  { %v432_v46 = vld [vmem:[%s730_s0 + $0x18] sm:$0xff]  ;;  %v615_v0 = vld [vmem:[%s732_s3] ss:$0 sm:$0xff]  ;;  %v346_v8 = vld [vmem:[%s733_s4 + $0x8] sm:$0xff] }
   0xf   :  { %268 = vmatpush.msra.mxu1 %v255_v32  ;;  %449 = vmatpush.msra.mxu3 %v255_v32  ;;  %v345_v3 = vld [vmem:[%s733_s4] sm:$0xff]  ;;  %v347_v18 = vld [vmem:[%s733_s4 + $0x10] sm:$0xff]  ;;  %v348_v28 = vld [vmem:[%s733_s4 + $0x18] sm:$0xff] }
  0x10   :  { %440 = vmatpush.bf16.msra.mxu2 %v92_v11  ;;  %147 = vmatpush.bf16.msra.mxu0 %v92_v11  ;;  %v353_v13 = vld [vmem:[%s733_s4 + $0x40] sm:$0xff] }
  0x11   :  { %269 = vmatpush.msra.mxu1 %v254_v33  ;;  %450 = vmatpush.msra.mxu3 %v254_v33  ;;  %v355_v33 = vld [vmem:[%s733_s4 + $0x50] sm:$0xff] }
  0x13   :  { %270 = vmatpush.msra.mxu1 %v253_v34  ;;  %451 = vmatpush.msra.mxu3 %v253_v34 }
  0x14   :  { %441 = vmatpush.bf16.msra.mxu2 %v91_v14  ;;  %148 = vmatpush.bf16.msra.mxu0 %v91_v14 }
  0x15   :  { %271 = vmatpush.msra.mxu1 %v252_v37  ;;  %452 = vmatpush.msra.mxu3 %v252_v37 }
  0x17   :  { %272 = vmatpush.msra.mxu1 %v251_v38  ;;  %453 = vmatpush.msra.mxu3 %v251_v38  ;;  %v349_v38 = vld [vmem:[%s733_s4 + $0x20] sm:$0xff] }
  0x18   :  { %442 = vmatpush.bf16.msra.mxu2 %v90_v17  ;;  %149 = vmatpush.bf16.msra.mxu0 %v90_v17 }
  0x19   :  { %273 = vmatpush.msra.mxu1 %v250_v39  ;;  %454 = vmatpush.msra.mxu3 %v250_v39 }
  0x1b   :  { %274 = vmatpush.msra.mxu1 %v249_v40  ;;  %455 = vmatpush.msra.mxu3 %v249_v40 }
  0x1c   :  { %443 = vmatpush.bf16.msra.mxu2 %v89_v20  ;;  %150 = vmatpush.bf16.msra.mxu0 %v89_v20 }
  0x1d   :  { %275 = vmatpush.msra.mxu1 %v248_v41  ;;  %456 = vmatpush.msra.mxu3 %v248_v41 }
  0x1f   :  { %276 = vmatpush.msra.mxu1 %v247_v42  ;;  %457 = vmatpush.msra.mxu3 %v247_v42 }
  0x20   :  { %444 = vmatpush.bf16.msra.mxu2 %v88_v23  ;;  %151 = vmatpush.bf16.msra.mxu0 %v88_v23  ;;  %v354_v23 = vld [vmem:[%s733_s4 + $0x48] sm:$0xff] }
  0x21   :  { %277 = vmatpush.msra.mxu1 %v246_v43  ;;  %458 = vmatpush.msra.mxu3 %v246_v43  ;;  %v356_v43 = vld [vmem:[%s733_s4 + $0x58] sm:$0xff] }
  0x23   :  { %172 = vmatmul.bf16.vlgmr.msra.gmra.mxu2 %v433_v24  ;;  %152 = vmatmul.bf16.vlgmr.msra.gmra.mxu0 %v429_v25 }
  0x24   :  { %278 = vmatpush.msra.mxu1 %v245_v44  ;;  %459 = vmatpush.msra.mxu3 %v245_v44 }
  0x26   :  { %279 = vmatpush.msra.mxu1 %v244_v47  ;;  %460 = vmatpush.msra.mxu3 %v244_v47 }
  0x33   :  { %177 = vmatmul.bf16.gmra.mxu2 %v434_v26  ;;  %157 = vmatmul.bf16.gmra.mxu0 %v430_v27 }
  0x43   :  { %182 = vmatmul.bf16.gmra.mxu2 %v435_v35  ;;  %162 = vmatmul.bf16.gmra.mxu0 %v431_v36 }
  0x53   :  { %187 = vmatmul.bf16.gmra.mxu2 %v436_v45  ;;  %167 = vmatmul.bf16.gmra.mxu0 %v432_v46 }
  0xa0   :  { %v153_v48 = vpop.f32.mrf.mxu0 }
  0xa1   :  { %280 = vmatmul.f32.vlgmr.msra.gmra.mxu1 %v153_v48  ;;  %v350_v48 = vld [vmem:[%s733_s4 + $0x28] sm:$0xff] }
  0xa6   :  { %v173_v49 = vpop.f32.mrf.mxu2 }
  0xa7   :  { %304 = vmatmul.f32.vlgmr.msra.gmra.mxu3 %v173_v49 }
  0xa8   :  { %v155_v50 = vpop.f32.mrf.mxu0 }
  0xa9   :  { %283 = vmatmul.f32.gmra.mxu1 %v155_v50 }
  0xae   :  { %v175_v51 = vpop.f32.mrf.mxu2 }
  0xaf   :  { %307 = vmatmul.f32.gmra.mxu3 %v175_v51 }
  0xb0   :  { %v158_v52 = vpop.f32.mrf.mxu0 }
  0xb1   :  { %286 = vmatmul.f32.gmra.mxu1 %v158_v52 }
  0xb6   :  { %v178_v53 = vpop.f32.mrf.mxu2 }
  0xb7   :  { %310 = vmatmul.f32.gmra.mxu3 %v178_v53  ;;  %v357_v53 = vld [vmem:[%s733_s4 + $0x60] sm:$0xff] }
  0xb8   :  { %v160_v54 = vpop.f32.mrf.mxu0 }
  0xb9   :  { %289 = vmatmul.f32.gmra.mxu1 %v160_v54 }
  0xbe   :  { %v180_v55 = vpop.f32.mrf.mxu2 }
  0xbf   :  { %313 = vmatmul.f32.gmra.mxu3 %v180_v55 }
  0xc0   :  { %v163_v56 = vpop.f32.mrf.mxu0 }
  0xc1   :  { %292 = vmatmul.f32.gmra.mxu1 %v163_v56 }
  0xc6   :  { %v183_v57 = vpop.f32.mrf.mxu2 }
  0xc7   :  { %316 = vmatmul.f32.gmra.mxu3 %v183_v57 }
  0xc8   :  { %v165_v58 = vpop.f32.mrf.mxu0 }
  0xc9   :  { %295 = vmatmul.f32.gmra.mxu1 %v165_v58  ;;  %v351_v58 = vld [vmem:[%s733_s4 + $0x30] sm:$0xff] }
  0xce   :  { %v185_v59 = vpop.f32.mrf.mxu2 }
  0xcf   :  { %319 = vmatmul.f32.gmra.mxu3 %v185_v59 }
  0xd0   :  { %v168_v60 = vpop.f32.mrf.mxu0 }
  0xd1   :  { %298 = vmatmul.f32.gmra.mxu1 %v168_v60 }
  0xd6   :  { %v188_v61 = vpop.f32.mrf.mxu2 }
  0xd7   :  { %322 = vmatmul.f32.gmra.mxu3 %v188_v61 }
  0xd8   :  { %v170_v62 = vpop.f32.mrf.mxu0 }
  0xd9   :  { %301 = vmatmul.f32.gmra.mxu1 %v170_v62 }
  0xde   :  { %v190_v63 = vpop.f32.mrf.mxu2 }
  0xdf   :  { %325 = vmatmul.f32.gmra.mxu3 %v190_v63  ;;  %v358_v63 = vld [vmem:[%s733_s4 + $0x68] sm:$0xff] }
 0x11e   :  { %v281_v1 = vpop.f32.mrf.mxu1 }
 0x11f   :  { %v282_v2 = vadd.f32 %v615_v0, %v281_v1 }
 0x121   :  { %v329_v4 = vmax.f32 %v282_v2, 0.0 }
 0x123   :  { %v361_v5 = vadd.f32 %v345_v3, %v329_v4 }
 0x125   :  { %377 = vst [vmem:[%s734_s5] sm:$0xff] %v361_v5  ;;  %v352_v5 = vld [vmem:[%s733_s4 + $0x38] sm:$0xff] }
 0x126   :  { %v284_v6 = vpop.f32.mrf.mxu1 }
 0x127   :  { %v285_v7 = vadd.f32 %v615_v0, %v284_v6 }
 0x129   :  { %v330_v9 = vmax.f32 %v285_v7, 0.0 }
 0x12a   :  { %v305_v10 = vpop.f32.mrf.mxu3 }
 0x12b   :  { %v362_v11 = vadd.f32 %v346_v8, %v330_v9  ;;  %v306_v12 = vadd.f32 %v615_v0, %v305_v10  ;;  %v359_v10 = vld [vmem:[%s733_s4 + $0x70] sm:$0xff] }
 0x12d   :  { %378 = vst [vmem:[%s734_s5 + $0x8] sm:$0xff] %v362_v11  ;;  %v337_v14 = vmax.f32 %v306_v12, 0.0 }
 0x12e   :  { %v287_v15 = vpop.f32.mrf.mxu1 }
 0x12f   :  { %v369_v16 = vadd.f32 %v353_v13, %v337_v14  ;;  %v288_v17 = vadd.f32 %v615_v0, %v287_v15  ;;  %v360_v15 = vld [vmem:[%s733_s4 + $0x78] sm:$0xff] }
 0x131   :  { %385 = vst [vmem:[%s734_s5 + $0x40] sm:$0xff] %v369_v16  ;;  %v331_v19 = vmax.f32 %v288_v17, 0.0 }
 0x132   :  { %v308_v20 = vpop.f32.mrf.mxu3 }
 0x133   :  { %v363_v21 = vadd.f32 %v347_v18, %v331_v19  ;;  %v309_v22 = vadd.f32 %v615_v0, %v308_v20 }
 0x135   :  { %379 = vst [vmem:[%s734_s5 + $0x10] sm:$0xff] %v363_v21  ;;  %v338_v24 = vmax.f32 %v309_v22, 0.0 }
 0x136   :  { %v290_v25 = vpop.f32.mrf.mxu1 }
 0x137   :  { %v370_v26 = vadd.f32 %v354_v23, %v338_v24  ;;  %v291_v27 = vadd.f32 %v615_v0, %v290_v25 }
 0x139   :  { %386 = vst [vmem:[%s734_s5 + $0x48] sm:$0xff] %v370_v26  ;;  %v332_v29 = vmax.f32 %v291_v27, 0.0 }
 0x13a   :  { %v311_v30 = vpop.f32.mrf.mxu3 }
 0x13b   :  { %v364_v31 = vadd.f32 %v348_v28, %v332_v29  ;;  %v312_v32 = vadd.f32 %v615_v0, %v311_v30 }
 0x13d   :  { %380 = vst [vmem:[%s734_s5 + $0x18] sm:$0xff] %v364_v31  ;;  %v339_v34 = vmax.f32 %v312_v32, 0.0 }
 0x13e   :  { %v293_v35 = vpop.f32.mrf.mxu1 }
 0x13f   :  { %v371_v36 = vadd.f32 %v355_v33, %v339_v34  ;;  %v294_v37 = vadd.f32 %v615_v0, %v293_v35 }
 0x141   :  { %387 = vst [vmem:[%s734_s5 + $0x50] sm:$0xff] %v371_v36  ;;  %v333_v39 = vmax.f32 %v294_v37, 0.0 }
 0x142   :  { %v314_v40 = vpop.f32.mrf.mxu3 }
 0x143   :  { %v365_v41 = vadd.f32 %v349_v38, %v333_v39  ;;  %v315_v42 = vadd.f32 %v615_v0, %v314_v40 }
 0x145   :  { %381 = vst [vmem:[%s734_s5 + $0x20] sm:$0xff] %v365_v41  ;;  %v340_v44 = vmax.f32 %v315_v42, 0.0 }
 0x146   :  { %v296_v45 = vpop.f32.mrf.mxu1 }
 0x147   :  { %v372_v46 = vadd.f32 %v356_v43, %v340_v44  ;;  %v297_v47 = vadd.f32 %v615_v0, %v296_v45 }
 0x149   :  { %388 = vst [vmem:[%s734_s5 + $0x58] sm:$0xff] %v372_v46  ;;  %v334_v49 = vmax.f32 %v297_v47, 0.0 }
 0x14a   :  { %v317_v50 = vpop.f32.mrf.mxu3 }
 0x14b   :  { %v366_v51 = vadd.f32 %v350_v48, %v334_v49  ;;  %v318_v52 = vadd.f32 %v615_v0, %v317_v50 }
 0x14d   :  { %382 = vst [vmem:[%s734_s5 + $0x28] sm:$0xff] %v366_v51  ;;  %v341_v54 = vmax.f32 %v318_v52, 0.0 }
 0x14e   :  { %v299_v55 = vpop.f32.mrf.mxu1 }
 0x14f   :  { %v373_v56 = vadd.f32 %v357_v53, %v341_v54  ;;  %v300_v57 = vadd.f32 %v615_v0, %v299_v55 }
 0x151   :  { %389 = vst [vmem:[%s734_s5 + $0x60] sm:$0xff] %v373_v56  ;;  %v335_v59 = vmax.f32 %v300_v57, 0.0 }
 0x152   :  { %v320_v60 = vpop.f32.mrf.mxu3 }
 0x153   :  { %v367_v61 = vadd.f32 %v351_v58, %v335_v59  ;;  %v321_v62 = vadd.f32 %v615_v0, %v320_v60 }
 0x155   :  { %383 = vst [vmem:[%s734_s5 + $0x30] sm:$0xff] %v367_v61  ;;  %v342_v1 = vmax.f32 %v321_v62, 0.0 }
 0x156   :  { %v302_v2 = vpop.f32.mrf.mxu1 }
 0x157   :  { %v374_v3 = vadd.f32 %v358_v63, %v342_v1  ;;  %v303_v4 = vadd.f32 %v615_v0, %v302_v2 }
 0x159   :  { %390 = vst [vmem:[%s734_s5 + $0x68] sm:$0xff] %v374_v3  ;;  %v336_v6 = vmax.f32 %v303_v4, 0.0 }
 0x15a   :  { %v323_v7 = vpop.f32.mrf.mxu3 }
 0x15b   :  { %v368_v8 = vadd.f32 %v352_v5, %v336_v6  ;;  %v324_v9 = vadd.f32 %v615_v0, %v323_v7 }
 0x15d   :  { %384 = vst [vmem:[%s734_s5 + $0x38] sm:$0xff] %v368_v8  ;;  %v343_v11 = vmax.f32 %v324_v9, 0.0 }
 0x15f   :  { %v375_v12 = vadd.f32 %v359_v10, %v343_v11 }
 0x161   :  { %391 = vst [vmem:[%s734_s5 + $0x70] sm:$0xff] %v375_v12 }
 0x162   :  { %v326_v13 = vpop.f32.mrf.mxu3 }
 0x163   :  { %v327_v14 = vadd.f32 %v615_v0, %v326_v13 }
 0x165   :  { %v344_v16 = vmax.f32 %v327_v14, 0.0 }
 0x167   :  { %v376_v17 = vadd.f32 %v360_v15, %v344_v16 }
 0x169   :  { %392 = vst [vmem:[%s734_s5 + $0x78] sm:$0xff] %v376_v17 }

// kernel: sg_model_forward.2
= control target key start
LH: loop header
LB: loop body
LE: loop exit
PB: predicated region body
PF: predicated region fallthrough
CT: control target
= control target key end

     0   :  { %s952_s1 = inlined_call_operand.vmem [shape: f32[128,128], index: 1, kind: input, shape index: {}, may-alias: {1,4}]   ;;  %s953_s0 = inlined_call_operand.vmem [shape: bf16[128,128], index: 0, kind: input, shape index: {}]   ;;  %s954_s5 = inlined_call_operand.vmem [shape: f32[128,128], index: 5, kind: input, shape index: {}]   ;;  %s955_s2 = inlined_call_operand.vmem [shape: f32[128,128], index: 2, kind: input, shape index: {}]   ;;  %s956_s4 = inlined_call_operand.vmem [shape: f32[128,128], index: 4, kind: input, shape index: {}, may-alias: {1,4}]   ;;  %s957_s3 = inlined_call_operand.vmem [shape: f32[1,128], index: 3, kind: input, shape index: {}]   ;;  %s958_s6 = inlined_call_operand.vmem [shape: f32[1,128], index: 6, kind: input, shape index: {}]   ;;  %s959_s7 = inlined_call_operand.vmem [shape: f32[128,128], index: 7, kind: output, shape index: {}]  }
   0x1   :  { %v92_v0 = vld [vmem:[%s952_s1 + $0x70] sm:$0xff]  ;;  %v93_v1 = vld [vmem:[%s952_s1 + $0x78] sm:$0xff]  ;;  %v90_v2 = vld [vmem:[%s952_s1 + $0x60] sm:$0xff] }
   0x2   :  { %v101_v3 = vpack.c.bf16 %v93_v1, %v92_v0  ;;  %v91_v4 = vld [vmem:[%s952_s1 + $0x68] sm:$0xff]  ;;  %v88_v6 = vld [vmem:[%s952_s1 + $0x50] sm:$0xff]  ;;  %v89_v7 = vld [vmem:[%s952_s1 + $0x58] sm:$0xff] }
   0x3   :  { %v100_v5 = vpack.c.bf16 %v91_v4, %v90_v2  ;;  %v99_v8 = vpack.c.bf16 %v89_v7, %v88_v6  ;;  %v86_v9 = vld [vmem:[%s952_s1 + $0x40] sm:$0xff]  ;;  %v87_v10 = vld [vmem:[%s952_s1 + $0x48] sm:$0xff]  ;;  %v84_v12 = vld [vmem:[%s952_s1 + $0x30] sm:$0xff] }
   0x4   :  { %150 = vmatpush.bf16.msra.mxu0 %v101_v3  ;;  %528 = vmatpush.bf16.msra.mxu3 %v101_v3  ;;  %v98_v11 = vpack.c.bf16 %v87_v10, %v86_v9  ;;  %v85_v13 = vld [vmem:[%s952_s1 + $0x38] sm:$0xff]  ;;  %v82_v15 = vld [vmem:[%s952_s1 + $0x20] sm:$0xff]  ;;  %v83_v16 = vld [vmem:[%s952_s1 + $0x28] sm:$0xff] }
   0x5   :  { %v97_v14 = vpack.c.bf16 %v85_v13, %v84_v12  ;;  %v96_v17 = vpack.c.bf16 %v83_v16, %v82_v15  ;;  %v80_v18 = vld [vmem:[%s952_s1 + $0x10] sm:$0xff]  ;;  %v81_v19 = vld [vmem:[%s952_s1 + $0x18] sm:$0xff]  ;;  %v78_v21 = vld [vmem:[%s952_s1] sm:$0xff] }
   0x6   :  { %v95_v20 = vpack.c.bf16 %v81_v19, %v80_v18  ;;  %v79_v22 = vld [vmem:[%s952_s1 + $0x8] sm:$0xff]  ;;  %v520_v24 = vld [vmem:[%s953_s0] sm:$0xff]  ;;  %v526_v25 = vld [vmem:[%s953_s0 + $0x30] sm:$0xff] }
   0x7   :  { %v94_v23 = vpack.c.bf16 %v79_v22, %v78_v21  ;;  %v521_v26 = vld [vmem:[%s953_s0 + $0x8] sm:$0xff]  ;;  %v527_v27 = vld [vmem:[%s953_s0 + $0x38] sm:$0xff]  ;;  %v522_v28 = vld [vmem:[%s953_s0 + $0x10] sm:$0xff] }
   0x8   :  { %151 = vmatpush.bf16.msra.mxu0 %v100_v5  ;;  %529 = vmatpush.bf16.msra.mxu3 %v100_v5  ;;  %v523_v29 = vld [vmem:[%s953_s0 + $0x18] sm:$0xff]  ;;  %v684_v31 = vld [vmem:[%s954_s5 + $0x70] sm:$0xff]  ;;  %v696_v34 = vld [vmem:[%s954_s5 + $0x68] sm:$0xff] }
   0x9   :  { %v679_v30 = vld [vmem:[%s954_s5 + $0x78] sm:$0xff]  ;;  %v264_v33 = vld [vmem:[%s955_s2 + $0x70] sm:$0xff]  ;;  %v263_v35 = vld [vmem:[%s955_s2 + $0x68] sm:$0xff] }
   0xa   :  { %v265_v32 = vld [vmem:[%s955_s2 + $0x78] sm:$0xff]  ;;  %371 = vmatpush.msra.mxu2 %v679_v30  ;;  %v705_v36 = vld [vmem:[%s954_s5 + $0x60] sm:$0xff]  ;;  %v723_v40 = vld [vmem:[%s954_s5 + $0x50] sm:$0xff] }
   0xb   :  { %270 = vmatpush.msra.mxu1 %v265_v32  ;;  %v262_v37 = vld [vmem:[%s955_s2 + $0x60] sm:$0xff]  ;;  %v714_v38 = vld [vmem:[%s954_s5 + $0x58] sm:$0xff]  ;;  %v260_v41 = vld [vmem:[%s955_s2 + $0x50] sm:$0xff] }
   0xc   :  { %152 = vmatpush.bf16.msra.mxu0 %v99_v8  ;;  %530 = vmatpush.bf16.msra.mxu3 %v99_v8  ;;  %v261_v39 = vld [vmem:[%s955_s2 + $0x58] sm:$0xff]  ;;  %v732_v42 = vld [vmem:[%s954_s5 + $0x48] sm:$0xff]  ;;  %v524_v44 = vld [vmem:[%s953_s0 + $0x20] sm:$0xff] }
   0xd   :  { %372 = vmatpush.msra.mxu2 %v684_v31  ;;  %271 = vmatpush.msra.mxu1 %v264_v33  ;;  %v259_v43 = vld [vmem:[%s955_s2 + $0x48] sm:$0xff]  ;;  %v744_v45 = vld [vmem:[%s954_s5 + $0x40] sm:$0xff]  ;;  %v753_v47 = vld [vmem:[%s954_s5 + $0x38] sm:$0xff] }
   0xe   :  { %v258_v46 = vld [vmem:[%s955_s2 + $0x40] sm:$0xff]  ;;  %v257_v48 = vld [vmem:[%s955_s2 + $0x38] sm:$0xff]  ;;  %v357_v49 = vld [vmem:[%s954_s5 + $0x30] sm:$0xff] }
   0xf   :  { %373 = vmatpush.msra.mxu2 %v696_v34  ;;  %272 = vmatpush.msra.mxu1 %v263_v35  ;;  %v256_v50 = vld [vmem:[%s955_s2 + $0x30] sm:$0xff]  ;;  %v356_v51 = vld [vmem:[%s954_s5 + $0x28] sm:$0xff]  ;;  %v355_v53 = vld [vmem:[%s954_s5 + $0x20] sm:$0xff] }
  0x10   :  { %153 = vmatpush.bf16.msra.mxu0 %v98_v11  ;;  %531 = vmatpush.bf16.msra.mxu3 %v98_v11  ;;  %v255_v52 = vld [vmem:[%s955_s2 + $0x28] sm:$0xff]  ;;  %v254_v54 = vld [vmem:[%s955_s2 + $0x20] sm:$0xff]  ;;  %v354_v55 = vld [vmem:[%s954_s5 + $0x18] sm:$0xff] }
  0x11   :  { %374 = vmatpush.msra.mxu2 %v705_v36  ;;  %273 = vmatpush.msra.mxu1 %v262_v37  ;;  %v253_v56 = vld [vmem:[%s955_s2 + $0x18] sm:$0xff]  ;;  %v353_v57 = vld [vmem:[%s954_s5 + $0x10] sm:$0xff]  ;;  %v352_v59 = vld [vmem:[%s954_s5 + $0x8] sm:$0xff] }
  0x12   :  { %v252_v58 = vld [vmem:[%s955_s2 + $0x10] sm:$0xff]  ;;  %v251_v60 = vld [vmem:[%s955_s2 + $0x8] sm:$0xff]  ;;  %v351_v62 = vld [vmem:[%s954_s5] sm:$0xff] }
  0x13   :  { %375 = vmatpush.msra.mxu2 %v714_v38  ;;  %274 = vmatpush.msra.mxu1 %v261_v39  ;;  %v525_v61 = vld [vmem:[%s953_s0 + $0x28] sm:$0xff]  ;;  %v335_v63 = vld [vmem:[%s956_s4] sm:$0xff]  ;;  %v337_v2 = vld [vmem:[%s956_s4 + $0x10] sm:$0xff] }
  0x14   :  { %154 = vmatpush.bf16.msra.mxu0 %v97_v14  ;;  %532 = vmatpush.bf16.msra.mxu3 %v97_v14  ;;  %v250_v0 = vld [vmem:[%s955_s2] sm:$0xff]  ;;  %v336_v1 = vld [vmem:[%s956_s4 + $0x8] sm:$0xff]  ;;  %v338_v3 = vld [vmem:[%s956_s4 + $0x18] sm:$0xff] }
  0x15   :  { %376 = vmatpush.msra.mxu2 %v723_v40  ;;  %275 = vmatpush.msra.mxu1 %v260_v41  ;;  %v339_v4 = vld [vmem:[%s956_s4 + $0x20] sm:$0xff]  ;;  %v340_v6 = vld [vmem:[%s956_s4 + $0x28] sm:$0xff]  ;;  %v341_v9 = vld [vmem:[%s956_s4 + $0x30] sm:$0xff] }
  0x16   :  { %v342_v12 = vld [vmem:[%s956_s4 + $0x38] sm:$0xff]  ;;  %v343_v15 = vld [vmem:[%s956_s4 + $0x40] sm:$0xff]  ;;  %v344_v18 = vld [vmem:[%s956_s4 + $0x48] sm:$0xff] }
  0x17   :  { %377 = vmatpush.msra.mxu2 %v732_v42  ;;  %276 = vmatpush.msra.mxu1 %v259_v43  ;;  %v347_v19 = vld [vmem:[%s956_s4 + $0x60] sm:$0xff]  ;;  %v345_v21 = vld [vmem:[%s956_s4 + $0x50] sm:$0xff]  ;;  %v348_v22 = vld [vmem:[%s956_s4 + $0x68] sm:$0xff] }
  0x18   :  { %155 = vmatpush.bf16.msra.mxu0 %v96_v17  ;;  %533 = vmatpush.bf16.msra.mxu3 %v96_v17 }
  0x19   :  { %378 = vmatpush.msra.mxu2 %v744_v45  ;;  %277 = vmatpush.msra.mxu1 %v258_v46 }
  0x1b   :  { %379 = vmatpush.msra.mxu2 %v753_v47  ;;  %278 = vmatpush.msra.mxu1 %v257_v48 }
  0x1c   :  { %156 = vmatpush.bf16.msra.mxu0 %v95_v20  ;;  %534 = vmatpush.bf16.msra.mxu3 %v95_v20 }
  0x1d   :  { %380 = vmatpush.msra.mxu2 %v357_v49  ;;  %279 = vmatpush.msra.mxu1 %v256_v50 }
  0x1f   :  { %381 = vmatpush.msra.mxu2 %v356_v51  ;;  %280 = vmatpush.msra.mxu1 %v255_v52 }
  0x20   :  { %157 = vmatpush.bf16.msra.mxu0 %v94_v23  ;;  %535 = vmatpush.bf16.msra.mxu3 %v94_v23 }
  0x21   :  { %382 = vmatpush.msra.mxu2 %v355_v53  ;;  %281 = vmatpush.msra.mxu1 %v254_v54 }
  0x23   :  { %158 = vmatmul.bf16.vlgmr.msra.gmra.mxu0 %v520_v24  ;;  %188 = vmatmul.bf16.vlgmr.msra.gmra.mxu3 %v526_v25  ;;  %v346_v24 = vld [vmem:[%s956_s4 + $0x58] sm:$0xff]  ;;  %v349_v25 = vld [vmem:[%s956_s4 + $0x70] sm:$0xff] }
  0x24   :  { %536 = vmatpush.msrb.mxu3 %v265_v32  ;;  %383 = vmatpush.msra.mxu2 %v354_v55 }
  0x25   :  { %282 = vmatpush.msra.mxu1 %v253_v56 }
  0x26   :  { %537 = vmatpush.msrb.mxu3 %v264_v33  ;;  %384 = vmatpush.msra.mxu2 %v353_v57 }
  0x27   :  { %283 = vmatpush.msra.mxu1 %v252_v58 }
  0x28   :  { %538 = vmatpush.msrb.mxu3 %v263_v35  ;;  %385 = vmatpush.msra.mxu2 %v352_v59  ;;  %v865_v35 = vld [vmem:[%s957_s3] ss:$0 sm:$0xff] }
  0x29   :  { %284 = vmatpush.msra.mxu1 %v251_v60 }
  0x2a   :  { %539 = vmatpush.msrb.mxu3 %v262_v37  ;;  %386 = vmatpush.msra.mxu2 %v351_v62 }
  0x2b   :  { %387 = vmatmul.f32.vlgmr.msra.gmra.mxu2 %v335_v63  ;;  %285 = vmatpush.msra.mxu1 %v250_v0 }
  0x2c   :  { %540 = vmatpush.msrb.mxu3 %v261_v39 }
  0x2e   :  { %541 = vmatpush.msrb.mxu3 %v260_v41 }
  0x30   :  { %542 = vmatpush.msrb.mxu3 %v259_v43 }
  0x32   :  { %543 = vmatpush.msrb.mxu3 %v258_v46 }
  0x33   :  { %163 = vmatmul.bf16.gmra.mxu0 %v521_v26  ;;  %193 = vmatmul.bf16.gmra.mxu3 %v527_v27  ;;  %v350_v27 = vld [vmem:[%s956_s4 + $0x78] sm:$0xff] }
  0x34   :  { %544 = vmatpush.msrb.mxu3 %v257_v48  ;;  %390 = vmatmul.f32.gmra.mxu2 %v336_v1 }
  0x36   :  { %545 = vmatpush.msrb.mxu3 %v256_v50 }
  0x38   :  { %546 = vmatpush.msrb.mxu3 %v255_v52 }
  0x3a   :  { %547 = vmatpush.msrb.mxu3 %v254_v54 }
  0x3c   :  { %548 = vmatpush.msrb.mxu3 %v253_v56  ;;  %393 = vmatmul.f32.gmra.mxu2 %v337_v2 }
  0x3e   :  { %549 = vmatpush.msrb.mxu3 %v252_v58 }
  0x40   :  { %550 = vmatpush.msrb.mxu3 %v251_v60 }
  0x42   :  { %551 = vmatpush.msrb.mxu3 %v250_v0 }
  0x43   :  { %168 = vmatmul.bf16.gmra.mxu0 %v522_v28 }
  0x44   :  { %552 = vmatpush.msra.mxu3 %v679_v30  ;;  %396 = vmatmul.f32.gmra.mxu2 %v338_v3 }
  0x46   :  { %553 = vmatpush.msra.mxu3 %v684_v31 }
  0x48   :  { %554 = vmatpush.msra.mxu3 %v696_v34 }
  0x4a   :  { %555 = vmatpush.msra.mxu3 %v705_v36  ;;  %v870_v36 = vld [vmem:[%s958_s6] ss:$0 sm:$0xff] }
  0x4c   :  { %556 = vmatpush.msra.mxu3 %v714_v38  ;;  %399 = vmatmul.f32.gmra.mxu2 %v339_v4 }
  0x4e   :  { %557 = vmatpush.msra.mxu3 %v723_v40 }
  0x50   :  { %558 = vmatpush.msra.mxu3 %v732_v42 }
  0x52   :  { %559 = vmatpush.msra.mxu3 %v744_v45 }
  0x53   :  { %173 = vmatmul.bf16.gmra.mxu0 %v523_v29 }
  0x54   :  { %560 = vmatpush.msra.mxu3 %v753_v47  ;;  %402 = vmatmul.f32.gmra.mxu2 %v340_v6 }
  0x56   :  { %561 = vmatpush.msra.mxu3 %v357_v49 }
  0x58   :  { %562 = vmatpush.msra.mxu3 %v356_v51 }
  0x5a   :  { %563 = vmatpush.msra.mxu3 %v355_v53 }
  0x5c   :  { %564 = vmatpush.msra.mxu3 %v354_v55  ;;  %405 = vmatmul.f32.gmra.mxu2 %v341_v9 }
  0x5e   :  { %565 = vmatpush.msra.mxu3 %v353_v57 }
  0x60   :  { %566 = vmatpush.msra.mxu3 %v352_v59 }
  0x62   :  { %567 = vmatpush.msra.mxu3 %v351_v62 }
  0x63   :  { %178 = vmatmul.bf16.gmra.mxu0 %v524_v44 }
  0x64   :  { %408 = vmatmul.f32.gmra.mxu2 %v342_v12 }
  0x6c   :  { %411 = vmatmul.f32.gmra.mxu2 %v343_v15 }
  0x73   :  { %183 = vmatmul.bf16.gmra.mxu0 %v525_v61 }
  0x74   :  { %414 = vmatmul.f32.gmra.mxu2 %v344_v18 }
  0x7c   :  { %417 = vmatmul.f32.gmra.mxu2 %v345_v21 }
  0x84   :  { %420 = vmatmul.f32.gmra.mxu2 %v346_v24 }
  0xa0   :  { %v159_v5 = vpop.f32.mrf.mxu0 }
  0xa1   :  { %286 = vmatmul.f32.vlgmr.msra.gmra.mxu1 %v159_v5 }
  0xa6   :  { %v189_v7 = vpop.f32.mrf.mxu3 }
  0xa7   :  { %322 = vmatmul.f32.vlgmr.msrb.gmra.mxu3 %v189_v7 }
  0xa8   :  { %v161_v8 = vpop.f32.mrf.mxu0 }
  0xa9   :  { %289 = vmatmul.f32.gmra.mxu1 %v161_v8 }
  0xae   :  { %v191_v10 = vpop.f32.mrf.mxu3  ;;  %v388_v32 = vpop.f32.mrf.mxu2 }
  0xaf   :  { %325 = vmatmul.f32.gmra.mxu3 %v191_v10  ;;  %v389_v39 = vadd.f32 %v870_v36, %v388_v32 }
  0xb0   :  { %v164_v11 = vpop.f32.mrf.mxu0 }
  0xb1   :  { %292 = vmatmul.f32.gmra.mxu1 %v164_v11 }
  0xb6   :  { %v194_v13 = vpop.f32.mrf.mxu3 }
  0xb7   :  { %328 = vmatmul.f32.gmra.mxu3 %v194_v13  ;;  %v391_v33 = vpop.f32.mrf.mxu2 }
  0xb8   :  { %v166_v14 = vpop.f32.mrf.mxu0  ;;  %v392_v45 = vadd.f32 %v870_v36, %v391_v33 }
  0xb9   :  { %295 = vmatmul.f32.gmra.mxu1 %v166_v14 }
  0xbe   :  { %v196_v16 = vpop.f32.mrf.mxu3 }
  0xbf   :  { %331 = vmatmul.f32.gmra.mxu3 %v196_v16  ;;  %v394_v34 = vpop.f32.mrf.mxu2 }
  0xc0   :  { %v169_v17 = vpop.f32.mrf.mxu0  ;;  %v395_v52 = vadd.f32 %v870_v36, %v394_v34 }
  0xc1   :  { %298 = vmatmul.f32.gmra.mxu1 %v169_v17 }
  0xc7   :  { %423 = vmatmul.f32.vlgmr.msra.gmra.mxu3 %v347_v19  ;;  %v397_v42 = vpop.f32.mrf.mxu2 }
  0xc8   :  { %v171_v20 = vpop.f32.mrf.mxu0  ;;  %v398_v58 = vadd.f32 %v870_v36, %v397_v42 }
  0xc9   :  { %301 = vmatmul.f32.gmra.mxu1 %v171_v20 }
  0xcf   :  { %426 = vmatmul.f32.gmra.mxu3 %v348_v22  ;;  %v400_v50 = vpop.f32.mrf.mxu2 }
  0xd0   :  { %v174_v23 = vpop.f32.mrf.mxu0  ;;  %v401_v1 = vadd.f32 %v870_v36, %v400_v50 }
  0xd1   :  { %304 = vmatmul.f32.gmra.mxu1 %v174_v23 }
  0xd7   :  { %429 = vmatmul.f32.gmra.mxu3 %v349_v25  ;;  %v403_v59 = vpop.f32.mrf.mxu2 }
  0xd8   :  { %v176_v26 = vpop.f32.mrf.mxu0  ;;  %v404_v9 = vadd.f32 %v870_v36, %v403_v59 }
  0xd9   :  { %307 = vmatmul.f32.gmra.mxu1 %v176_v26 }
  0xdf   :  { %432 = vmatmul.f32.gmra.mxu3 %v350_v27  ;;  %v406_v4 = vpop.f32.mrf.mxu2 }
  0xe0   :  { %v179_v28 = vpop.f32.mrf.mxu0  ;;  %v407_v20 = vadd.f32 %v870_v36, %v406_v4 }
  0xe1   :  { %310 = vmatmul.f32.gmra.mxu1 %v179_v28 }
  0xe7   :  { %v409_v15 = vpop.f32.mrf.mxu2 }
  0xe8   :  { %v181_v29 = vpop.f32.mrf.mxu0 }
  0xe9   :  { %313 = vmatmul.f32.gmra.mxu1 %v181_v29 }
  0xef   :  { %v412_v28 = vpop.f32.mrf.mxu2 }
  0xf0   :  { %v184_v30 = vpop.f32.mrf.mxu0 }
  0xf1   :  { %316 = vmatmul.f32.gmra.mxu1 %v184_v30 }
  0xf8   :  { %v186_v31 = vpop.f32.mrf.mxu0 }
  0xf9   :  { %319 = vmatmul.f32.gmra.mxu1 %v186_v31  ;;  %v410_v31 = vadd.f32 %v870_v36, %v409_v15 }
 0x11e   :  { %v287_v37 = vpop.f32.mrf.mxu1 }
 0x11f   :  { %v288_v38 = vadd.f32 %v865_v35, %v287_v37 }
 0x121   :  { %v436_v40 = vmax.f32 %v288_v38, 0.0 }
 0x123   :  { %v452_v41 = vadd.f32 %v436_v40, %v389_v39 }
 0x125   :  { %468 = vst [vmem:[%s959_s7] sm:$0xff] %v452_v41 }
 0x126   :  { %v290_v43 = vpop.f32.mrf.mxu1 }
 0x127   :  { %v291_v44 = vadd.f32 %v865_v35, %v290_v43  ;;  %v413_v43 = vadd.f32 %v870_v36, %v412_v28 }
 0x129   :  { %v437_v46 = vmax.f32 %v291_v44, 0.0  ;;  %v415_v44 = vpop.f32.mrf.mxu2 }
 0x12a   :  { %v323_v47 = vpop.f32.mrf.mxu3 }
 0x12b   :  { %v453_v48 = vadd.f32 %v437_v46, %v392_v45  ;;  %v324_v7 = vadd.f32 %v865_v35, %v323_v47 }
 0x12d   :  { %469 = vst [vmem:[%s959_s7 + $0x8] sm:$0xff] %v453_v48  ;;  %v448_v12 = vmax.f32 %v324_v7, 0.0 }
 0x12e   :  { %v293_v49 = vpop.f32.mrf.mxu1 }
 0x12f   :  { %v294_v51 = vadd.f32 %v865_v35, %v293_v49 }
 0x131   :  { %v438_v53 = vmax.f32 %v294_v51, 0.0 }
 0x132   :  { %v326_v54 = vpop.f32.mrf.mxu3 }
 0x133   :  { %v454_v55 = vadd.f32 %v438_v53, %v395_v52  ;;  %v327_v18 = vadd.f32 %v865_v35, %v326_v54  ;;  %v416_v53 = vadd.f32 %v870_v36, %v415_v44 }
 0x135   :  { %470 = vst [vmem:[%s959_s7 + $0x10] sm:$0xff] %v454_v55  ;;  %v449_v23 = vmax.f32 %v327_v18, 0.0  ;;  %v418_v55 = vpop.f32.mrf.mxu2 }
 0x136   :  { %v296_v56 = vpop.f32.mrf.mxu1  ;;  %v419_v59 = vadd.f32 %v870_v36, %v418_v55 }
 0x137   :  { %v297_v57 = vadd.f32 %v865_v35, %v296_v56 }
 0x139   :  { %v439_v60 = vmax.f32 %v297_v57, 0.0 }
 0x13a   :  { %v329_v61 = vpop.f32.mrf.mxu3 }
 0x13b   :  { %v455_v62 = vadd.f32 %v439_v60, %v398_v58  ;;  %v330_v29 = vadd.f32 %v865_v35, %v329_v61 }
 0x13d   :  { %471 = vst [vmem:[%s959_s7 + $0x18] sm:$0xff] %v455_v62  ;;  %v450_v34 = vmax.f32 %v330_v29, 0.0  ;;  %v421_v62 = vpop.f32.mrf.mxu2 }
 0x13e   :  { %v299_v63 = vpop.f32.mrf.mxu1 }
 0x13f   :  { %v300_v0 = vadd.f32 %v865_v35, %v299_v63 }
 0x141   :  { %v440_v2 = vmax.f32 %v300_v0, 0.0 }
 0x142   :  { %v332_v3 = vpop.f32.mrf.mxu3 }
 0x143   :  { %v456_v5 = vadd.f32 %v440_v2, %v401_v1  ;;  %v333_v41 = vadd.f32 %v865_v35, %v332_v3  ;;  %v422_v1 = vadd.f32 %v870_v36, %v421_v62 }
 0x145   :  { %472 = vst [vmem:[%s959_s7 + $0x20] sm:$0xff] %v456_v5  ;;  %v451_v47 = vmax.f32 %v333_v41, 0.0 }
 0x146   :  { %v302_v6 = vpop.f32.mrf.mxu1 }
 0x147   :  { %v303_v8 = vadd.f32 %v865_v35, %v302_v6 }
 0x149   :  { %v441_v10 = vmax.f32 %v303_v8, 0.0 }
 0x14a   :  { %v424_v11 = vpop.f32.mrf.mxu3 }
 0x14b   :  { %v457_v13 = vadd.f32 %v441_v10, %v404_v9  ;;  %v425_v14 = vadd.f32 %v870_v36, %v424_v11 }
 0x14d   :  { %473 = vst [vmem:[%s959_s7 + $0x28] sm:$0xff] %v457_v13  ;;  %v464_v16 = vadd.f32 %v448_v12, %v425_v14 }
 0x14e   :  { %v305_v17 = vpop.f32.mrf.mxu1 }
 0x14f   :  { %480 = vst [vmem:[%s959_s7 + $0x60] sm:$0xff] %v464_v16  ;;  %v306_v19 = vadd.f32 %v865_v35, %v305_v17 }
 0x151   :  { %v442_v21 = vmax.f32 %v306_v19, 0.0 }
 0x152   :  { %v427_v22 = vpop.f32.mrf.mxu3 }
 0x153   :  { %v458_v24 = vadd.f32 %v442_v21, %v407_v20  ;;  %v428_v25 = vadd.f32 %v870_v36, %v427_v22 }
 0x155   :  { %474 = vst [vmem:[%s959_s7 + $0x30] sm:$0xff] %v458_v24  ;;  %v465_v26 = vadd.f32 %v449_v23, %v428_v25 }
 0x156   :  { %v308_v27 = vpop.f32.mrf.mxu1 }
 0x157   :  { %481 = vst [vmem:[%s959_s7 + $0x68] sm:$0xff] %v465_v26  ;;  %v309_v30 = vadd.f32 %v865_v35, %v308_v27 }
 0x159   :  { %v443_v32 = vmax.f32 %v309_v30, 0.0 }
 0x15a   :  { %v430_v33 = vpop.f32.mrf.mxu3 }
 0x15b   :  { %v459_v37 = vadd.f32 %v443_v32, %v410_v31  ;;  %v431_v38 = vadd.f32 %v870_v36, %v430_v33 }
 0x15d   :  { %475 = vst [vmem:[%s959_s7 + $0x38] sm:$0xff] %v459_v37  ;;  %v466_v39 = vadd.f32 %v450_v34, %v431_v38 }
 0x15e   :  { %v311_v40 = vpop.f32.mrf.mxu1 }
 0x15f   :  { %482 = vst [vmem:[%s959_s7 + $0x70] sm:$0xff] %v466_v39  ;;  %v312_v42 = vadd.f32 %v865_v35, %v311_v40 }
 0x161   :  { %v444_v45 = vmax.f32 %v312_v42, 0.0 }
 0x162   :  { %v433_v46 = vpop.f32.mrf.mxu3 }
 0x163   :  { %v460_v48 = vadd.f32 %v444_v45, %v413_v43  ;;  %v434_v49 = vadd.f32 %v870_v36, %v433_v46 }
 0x165   :  { %476 = vst [vmem:[%s959_s7 + $0x40] sm:$0xff] %v460_v48  ;;  %v467_v50 = vadd.f32 %v451_v47, %v434_v49 }
 0x166   :  { %v314_v51 = vpop.f32.mrf.mxu1 }
 0x167   :  { %483 = vst [vmem:[%s959_s7 + $0x78] sm:$0xff] %v467_v50  ;;  %v315_v52 = vadd.f32 %v865_v35, %v314_v51 }
 0x169   :  { %v445_v54 = vmax.f32 %v315_v52, 0.0 }
 0x16b   :  { %v461_v56 = vadd.f32 %v445_v54, %v416_v53 }
 0x16d   :  { %477 = vst [vmem:[%s959_s7 + $0x48] sm:$0xff] %v461_v56 }
 0x16e   :  { %v317_v57 = vpop.f32.mrf.mxu1 }
 0x16f   :  { %v318_v58 = vadd.f32 %v865_v35, %v317_v57 }
 0x171   :  { %v446_v60 = vmax.f32 %v318_v58, 0.0 }
 0x173   :  { %v462_v61 = vadd.f32 %v446_v60, %v419_v59 }
 0x175   :  { %478 = vst [vmem:[%s959_s7 + $0x50] sm:$0xff] %v462_v61 }
 0x176   :  { %v320_v63 = vpop.f32.mrf.mxu1 }
 0x177   :  { %v321_v0 = vadd.f32 %v865_v35, %v320_v63 }
 0x179   :  { %v447_v2 = vmax.f32 %v321_v0, 0.0 }
 0x17b   :  { %v463_v3 = vadd.f32 %v447_v2, %v422_v1 }
 0x17d   :  { %479 = vst [vmem:[%s959_s7 + $0x58] sm:$0xff] %v463_v3 }

</bundles_post_ra>
